<compile_context>
chip_gen: v7x
topology: tpu7x:2x2x1
jax: 0.10.0
libtpu: 0.0.40
codegen_flags: <defaults>
</compile_context>

<pallas_src>
import functools
import math

import jax
import jax.numpy as jnp
from jax.experimental import pallas as pl
from jax.experimental.pallas import tpu as pltpu


# ---------------------------------------------------------------------------
# Tiling helper
# ---------------------------------------------------------------------------

def _pick_tile(dim, cap, align):
    """Largest tile <= cap that divides dim and is a multiple of align.

    Falls back to the full dimension (always a legal block extent)."""
    if dim <= cap:
        return dim
    t = (cap // align) * align
    while t >= align:
        if dim % t == 0:
            return t
        t -= align
    return dim


# ---------------------------------------------------------------------------
# Tiled linear (optionally fused GELU) — bf16 MXU inputs, f32 accumulation
#   * K <= tk_cap  : single pass over K, no accumulator scratch, grid (N, M)
#   * K  > tk_cap  : K grid axis with f32 VMEM accumulator (fallback)
# ---------------------------------------------------------------------------

def _linear_1pass_kernel(x_ref, w_ref, b_ref, o_ref, *, activation):
    y = jnp.dot(x_ref[...], w_ref[...], preferred_element_type=jnp.float32)
    y = y + b_ref[...]
    if activation == "gelu":
        # tanh-approx GELU; HF DistilBERT uses exact-erf GELU (<1e-3 diff)
        y = jax.nn.gelu(y)
    o_ref[...] = y.astype(o_ref.dtype)


def _linear_acc_kernel(x_ref, w_ref, b_ref, o_ref, acc_ref, *, activation):
    @pl.when(pl.program_id(2) == 0)
    def _():
        acc_ref[...] = jnp.zeros_like(acc_ref)

    acc_ref[...] += jnp.dot(x_ref[...], w_ref[...],
                            preferred_element_type=jnp.float32)

    @pl.when(pl.program_id(2) == pl.num_programs(2) - 1)
    def _():
        y = acc_ref[...] + b_ref[...]
        if activation == "gelu":
            y = jax.nn.gelu(y)
        o_ref[...] = y.astype(o_ref.dtype)


def linear(x, w, b, activation=None, *, out_dtype=jnp.bfloat16,
           tm=512, tn=512, tk_cap=1024):
    """x:(M,K) @ w:(K,N) + b:(N,).  Full-K single pass when K <= tk_cap."""
    M, K = x.shape
    N = w.shape[1]
    tm = _pick_tile(M, tm, 8)
    tn = _pick_tile(N, tn, 128)
    xb = x.astype(jnp.bfloat16)
    wb = w.astype(jnp.bfloat16)
    bb = b.reshape(1, N).astype(jnp.float32)

    if K <= tk_cap:
        # N axis first: keeps the leading parallel axis non-degenerate even
        # when M is tiny (classifier: M == batch).
        grid = (N // tn, M // tm)
        return pl.pallas_call(
            functools.partial(_linear_1pass_kernel, activation=activation),
            grid=grid,
            in_specs=[
                pl.BlockSpec((tm, K), lambda j, i: (i, 0)),
                pl.BlockSpec((K, tn), lambda j, i: (0, j)),
                pl.BlockSpec((1, tn), lambda j, i: (0, j)),
            ],
            out_specs=pl.BlockSpec((tm, tn), lambda j, i: (i, j)),
            out_shape=jax.ShapeDtypeStruct((M, N), out_dtype),
            compiler_params=pltpu.CompilerParams(
                dimension_semantics=("parallel", "parallel")),
        )(xb, wb, bb)

    tk = _pick_tile(K, tk_cap, 128)
    grid = (M // tm, N // tn, K // tk)
    return pl.pallas_call(
        functools.partial(_linear_acc_kernel, activation=activation),
        grid=grid,
        in_specs=[
            pl.BlockSpec((tm, tk), lambda i, j, k: (i, k)),
            pl.BlockSpec((tk, tn), lambda i, j, k: (k, j)),
            pl.BlockSpec((1, tn), lambda i, j, k: (0, j)),
        ],
        out_specs=pl.BlockSpec((tm, tn), lambda i, j, k: (i, j)),
        out_shape=jax.ShapeDtypeStruct((M, N), out_dtype),
        scratch_shapes=[pltpu.VMEM((tm, tn), jnp.float32)],
        compiler_params=pltpu.CompilerParams(
            dimension_semantics=("parallel", "parallel", "arbitrary")),
    )(xb, wb, bb)


# ---------------------------------------------------------------------------
# Tiled linear with fused residual-add + LayerNorm epilogue
# (LN reduces over the full feature dim, so the N tile is the full hidden D)
# ---------------------------------------------------------------------------

def _linear_add_ln_1pass_kernel(x_ref, w_ref, b_ref, r_ref, g_ref, bb_ref,
                                o_ref, *, eps):
    y = jnp.dot(x_ref[...], w_ref[...], preferred_element_type=jnp.float32)
    y = y + b_ref[...] + r_ref[...].astype(jnp.float32)
    mu = jnp.mean(y, axis=-1, keepdims=True)
    var = jnp.mean(jnp.square(y - mu), axis=-1, keepdims=True)
    o_ref[...] = ((y - mu) * jax.lax.rsqrt(var + eps) * g_ref[...]
                  + bb_ref[...]).astype(o_ref.dtype)


def _linear_add_ln_acc_kernel(x_ref, w_ref, b_ref, r_ref, g_ref, bb_ref,
                              o_ref, acc_ref, *, eps):
    @pl.when(pl.program_id(1) == 0)
    def _():
        acc_ref[...] = jnp.zeros_like(acc_ref)

    acc_ref[...] += jnp.dot(x_ref[...], w_ref[...],
                            preferred_element_type=jnp.float32)

    @pl.when(pl.program_id(1) == pl.num_programs(1) - 1)
    def _():
        y = acc_ref[...] + b_ref[...] + r_ref[...].astype(jnp.float32)
        mu = jnp.mean(y, axis=-1, keepdims=True)
        var = jnp.mean(jnp.square(y - mu), axis=-1, keepdims=True)
        o_ref[...] = ((y - mu) * jax.lax.rsqrt(var + eps) * g_ref[...]
                      + bb_ref[...]).astype(o_ref.dtype)


def linear_add_layernorm(x, w, b, resid, gamma, beta, *, eps=1e-12,
                         out_dtype=jnp.bfloat16, tm=512, tk_cap=1024):
    M, K = x.shape
    N = w.shape[1]          # == hidden D
    tm = _pick_tile(M, tm, 8)
    xb = x.astype(jnp.bfloat16)
    wb = w.astype(jnp.bfloat16)
    bf = b.reshape(1, N).astype(jnp.float32)
    rb = resid.astype(jnp.bfloat16)
    gf = gamma.reshape(1, N).astype(jnp.float32)
    bt = beta.reshape(1, N).astype(jnp.float32)

    if K <= tk_cap:
        return pl.pallas_call(
            functools.partial(_linear_add_ln_1pass_kernel, eps=eps),
            grid=(M // tm,),
            in_specs=[
                pl.BlockSpec((tm, K), lambda i: (i, 0)),
                pl.BlockSpec((K, N), lambda i: (0, 0)),
                pl.BlockSpec((1, N), lambda i: (0, 0)),
                pl.BlockSpec((tm, N), lambda i: (i, 0)),
                pl.BlockSpec((1, N), lambda i: (0, 0)),
                pl.BlockSpec((1, N), lambda i: (0, 0)),
            ],
            out_specs=pl.BlockSpec((tm, N), lambda i: (i, 0)),
            out_shape=jax.ShapeDtypeStruct((M, N), out_dtype),
            compiler_params=pltpu.CompilerParams(
                dimension_semantics=("parallel",)),
        )(xb, wb, bf, rb, gf, bt)

    tk = _pick_tile(K, tk_cap, 128)
    grid = (M // tm, K // tk)
    return pl.pallas_call(
        functools.partial(_linear_add_ln_acc_kernel, eps=eps),
        grid=grid,
        in_specs=[
            pl.BlockSpec((tm, tk), lambda i, k: (i, k)),
            pl.BlockSpec((tk, N), lambda i, k: (k, 0)),
            pl.BlockSpec((1, N), lambda i, k: (0, 0)),
            pl.BlockSpec((tm, N), lambda i, k: (i, 0)),
            pl.BlockSpec((1, N), lambda i, k: (0, 0)),
            pl.BlockSpec((1, N), lambda i, k: (0, 0)),
        ],
        out_specs=pl.BlockSpec((tm, N), lambda i, k: (i, 0)),
        out_shape=jax.ShapeDtypeStruct((M, N), out_dtype),
        scratch_shapes=[pltpu.VMEM((tm, N), jnp.float32)],
        compiler_params=pltpu.CompilerParams(
            dimension_semantics=("parallel", "arbitrary")),
    )(xb, wb, bf, rb, gf, bt)


# ---------------------------------------------------------------------------
# Plain LayerNorm (embedding LN — no residual)
# ---------------------------------------------------------------------------

def _layernorm_kernel(x_ref, g_ref, b_ref, o_ref, *, eps):
    y = x_ref[...].astype(jnp.float32)
    mu = jnp.mean(y, axis=-1, keepdims=True)
    var = jnp.mean(jnp.square(y - mu), axis=-1, keepdims=True)
    o_ref[...] = ((y - mu) * jax.lax.rsqrt(var + eps) * g_ref[...]
                  + b_ref[...]).astype(o_ref.dtype)


def layernorm(x, gamma, beta, *, eps=1e-12, out_dtype=jnp.bfloat16, tm=512):
    M, D = x.shape
    tm = _pick_tile(M, tm, 8)
    return pl.pallas_call(
        functools.partial(_layernorm_kernel, eps=eps),
        grid=(M // tm,),
        in_specs=[pl.BlockSpec((tm, D), lambda i: (i, 0)),
                  pl.BlockSpec((1, D), lambda i: (0, 0)),
                  pl.BlockSpec((1, D), lambda i: (0, 0))],
        out_specs=pl.BlockSpec((tm, D), lambda i: (i, 0)),
        out_shape=jax.ShapeDtypeStruct((M, D), out_dtype),
        compiler_params=pltpu.CompilerParams(dimension_semantics=("parallel",)),
    )(x, gamma.reshape(1, D).astype(jnp.float32),
      beta.reshape(1, D).astype(jnp.float32))


# ---------------------------------------------------------------------------
# Attention: flash-style kernel over (batch, head-group, kv-block).
# Each head-group block is a lane-dense 128-wide slab of the fused (B,S,3D)
# QKV activation, selected by the BlockSpec index_map (no JAX-level slicing).
# ---------------------------------------------------------------------------

def _flash_attn_kernel(q_ref, k_ref, v_ref, m_ref, o_ref,
                       m_scr, l_scr, acc_scr, *, heads_per_group, d_head):
    kv = pl.program_id(2)

    @pl.when(kv == 0)
    def _():
        m_scr[...] = jnp.full_like(m_scr, -jnp.inf)
        l_scr[...] = jnp.zeros_like(l_scr)
        acc_scr[...] = jnp.zeros_like(acc_scr)

    q = q_ref[0]            # (S,  gw) bf16; Q pre-scaled by 1/sqrt(d_head)
    k = k_ref[0]            # (tkv, gw) bf16
    v = v_ref[0]            # (tkv, gw) bf16
    mask = m_ref[0]         # (1, tkv)  f32 additive mask (0 / -1e9)

    for h in range(heads_per_group):        # small static loop (2 heads)
        lo = h * d_head
        qh = q[:, lo:lo + d_head]
        kh = k[:, lo:lo + d_head]
        vh = v[:, lo:lo + d_head]
        # q @ k^T via dot_general (contract last dims; no explicit transpose)
        s = jax.lax.dot_general(qh, kh, (((1,), (1,)), ((), ())),
                                preferred_element_type=jnp.float32)
        s = s + mask                                        # (S, tkv)
        m_prev = m_scr[h]                                   # (S, 1)
        m_new = jnp.maximum(m_prev, jnp.max(s, axis=-1, keepdims=True))
        alpha = jnp.exp(m_prev - m_new)
        p = jnp.exp(s - m_new)
        l_scr[h] = alpha * l_scr[h] + jnp.sum(p, axis=-1, keepdims=True)
        acc_scr[h] = alpha * acc_scr[h] + jnp.dot(
            p.astype(vh.dtype), vh, preferred_element_type=jnp.float32)
        m_scr[h] = m_new

    @pl.when(kv == pl.num_programs(2) - 1)
    def _():
        outs = [acc_scr[h] * pl.reciprocal(l_scr[h], approx=True)
                for h in range(heads_per_group)]
        o_ref[0] = jnp.concatenate(outs, axis=-1).astype(o_ref.dtype)


def attention(qkv, add_mask, num_heads, *, out_dtype=jnp.bfloat16, kv_cap=512):
    """qkv: (B, S, 3D) fused projections (Q pre-scaled); add_mask: (B, 1, S) f32."""
    B, S, three_d = qkv.shape
    D = three_d // 3
    d_head = D // num_heads

    # Group heads so each block's lane width is a 128-lane multiple
    # (DistilBERT: d_head=64 -> 2 heads per group -> 128-lane blocks).
    if d_head % 128 == 0:
        hpg = 1
    else:
        hpg = max(1, min(num_heads, 128 // d_head))
        while num_heads % hpg:
            hpg -= 1
    gw = hpg * d_head
    assert gw % 128 == 0, "head grouping must form 128-lane blocks"
    n_groups = num_heads // hpg

    tkv = _pick_tile(S, kv_cap, 128)
    grid = (B, n_groups, S // tkv)
    qkv_b = qkv.astype(jnp.bfloat16)

    return pl.pallas_call(
        functools.partial(_flash_attn_kernel,
                          heads_per_group=hpg, d_head=d_head),
        grid=grid,
        in_specs=[
            # Q group g lives at lanes [g*gw, (g+1)*gw)           -> block g
            pl.BlockSpec((1, S, gw), lambda b, g, kv: (b, 0, g)),
            # K group g lives at lanes [D + g*gw, ...)            -> block n_groups+g
            pl.BlockSpec((1, tkv, gw), lambda b, g, kv: (b, kv, n_groups + g)),
            # V group g lives at lanes [2D + g*gw, ...)           -> block 2*n_groups+g
            pl.BlockSpec((1, tkv, gw), lambda b, g, kv: (b, kv, 2 * n_groups + g)),
            pl.BlockSpec((1, 1, tkv), lambda b, g, kv: (b, 0, kv)),
        ],
        out_specs=pl.BlockSpec((1, S, gw), lambda b, g, kv: (b, 0, g)),
        out_shape=jax.ShapeDtypeStruct((B, S, D), out_dtype),
        scratch_shapes=[
            pltpu.VMEM((hpg, S, 1), jnp.float32),        # running max
            pltpu.VMEM((hpg, S, 1), jnp.float32),        # running denom
            pltpu.VMEM((hpg, S, d_head), jnp.float32),   # running output acc
        ],
        compiler_params=pltpu.CompilerParams(
            dimension_semantics=("parallel", "parallel", "arbitrary")),
    )(qkv_b, qkv_b, qkv_b, add_mask.astype(jnp.float32))


# ---------------------------------------------------------------------------
# Synthetic DistilBERT-style parameters (deterministic init)
# ---------------------------------------------------------------------------

def init_params(key, *, vocab, max_pos, D, H, L, F, n_out):
    def nrm(k, shape):
        return 0.02 * jax.random.normal(k, shape, dtype=jnp.float32)

    d_head = D // H
    q_scale = 1.0 / math.sqrt(d_head)
    n_out_pad = ((n_out + 127) // 128) * 128   # lane-dense classifier output

    keys = jax.random.split(key, 4 + L)
    fc1_w = nrm(keys[2], (D, n_out))
    params = {
        # embedding tables stored in bf16 (halves gather traffic; LN upcasts)
        "word_emb": nrm(keys[0], (vocab, D)).astype(jnp.bfloat16),
        "pos_emb": nrm(keys[1], (max_pos, D)).astype(jnp.bfloat16),
        "emb_ln_g": jnp.ones((D,), jnp.float32),
        "emb_ln_b": jnp.zeros((D,), jnp.float32),
        # fc1 = nn.Linear(embDim, 9919), stored as W^T and zero-padded to 9984
        # lanes so stores are unmasked; logits are sliced back to 9919.
        "fc1_w": jnp.pad(fc1_w, ((0, 0), (0, n_out_pad - n_out))).astype(jnp.bfloat16),
        "fc1_b": jnp.zeros((n_out_pad,), jnp.float32),
        "n_out": n_out,
        "layers": [],
    }
    for li in range(L):
        lk = jax.random.split(keys[4 + li], 6)
        wq, wk, wv = nrm(lk[0], (D, D)), nrm(lk[1], (D, D)), nrm(lk[2], (D, D))
        # fused QKV projection; 1/sqrt(d_head) folded into the Q slice
        # (Q bias would need the same scaling if it were nonzero).
        wqkv = jnp.concatenate([wq * q_scale, wk, wv], axis=1).astype(jnp.bfloat16)
        params["layers"].append({
            "wqkv": wqkv, "bqkv": jnp.zeros((3 * D,), jnp.float32),
            "wo": nrm(lk[3], (D, D)).astype(jnp.bfloat16),
            "bo": jnp.zeros((D,), jnp.float32),
            "ln1_g": jnp.ones((D,), jnp.float32), "ln1_b": jnp.zeros((D,), jnp.float32),
            "w1": nrm(lk[4], (D, F)).astype(jnp.bfloat16),
            "b1": jnp.zeros((F,), jnp.float32),
            "w2": nrm(lk[5], (F, D)).astype(jnp.bfloat16),
            "b2": jnp.zeros((D,), jnp.float32),
            "ln2_g": jnp.ones((D,), jnp.float32), "ln2_b": jnp.zeros((D,), jnp.float32),
        })
    return params


# ---------------------------------------------------------------------------
# BERTOnly.forward
# ---------------------------------------------------------------------------

def bert_only_forward(params, input_ids, attention_mask, *, num_heads):
    """input_ids, attention_mask: (B, S) int32 (already .squeeze(dim=1))."""
    B, S = input_ids.shape
    D = params["word_emb"].shape[1]

    # --- embeddings (table gather is JAX glue; LN is a Pallas kernel) ---
    x = params["word_emb"][input_ids] + params["pos_emb"][jnp.arange(S)][None, :, :]
    x2 = layernorm(x.reshape(B * S, D), params["emb_ln_g"], params["emb_ln_b"])

    # additive attention mask: 0 where attended, -1e9 where padded (kept in f32)
    add_mask = ((1.0 - attention_mask.astype(jnp.float32)) * -1e9).reshape(B, 1, S)

    # --- transformer encoder layers ---
    for layer in params["layers"]:
        # fused QKV projection: one single-pass MXU kernel with N = 3D, Q pre-scaled
        qkv = linear(x2, layer["wqkv"], layer["bqkv"]).reshape(B, S, 3 * D)
        a = attention(qkv, add_mask, num_heads)                     # (B, S, D)
        # output projection with fused residual-add + LayerNorm epilogue
        x2 = linear_add_layernorm(a.reshape(B * S, D), layer["wo"], layer["bo"],
                                  x2, layer["ln1_g"], layer["ln1_b"])
        # FFN: GELU fused into first matmul; second matmul fused with add+LN
        h = linear(x2, layer["w1"], layer["b1"], activation="gelu")
        x2 = linear_add_layernorm(h, layer["w2"], layer["b2"],
                                  x2, layer["ln2_g"], layer["ln2_b"])

    # --- last_hidden_state[:, 0, :]  (CLS token) ---
    cls = x2.reshape(B, S, D)[:, 0, :]

    # Dropout(p=0.5) is identity at inference time.
    # Classifier: M = B is tiny -> single-pass over K, large lane-dense N tiles,
    # N-leading grid so the parallel axis is non-degenerate (v7x dual-TC).
    logits = linear(cls, params["fc1_w"], params["fc1_b"],
                    out_dtype=jnp.float32, tn=1664)
    return logits[:, : params["n_out"]]         # (B, 9919)


# ---------------------------------------------------------------------------

if __name__ == "__main__":
    # Small but lane-aligned config: B=2, S=16, D=128, 2 heads (d_head=64),
    # 2 layers, FFN=512.  (Real DistilBERT: S=512, D=768, H=12, F=3072.)
    B, S = 2, 16
    VOCAB, MAX_POS, D, H, L, F = 100, 32, 128, 2, 2, 512
    N_OUT = 9919  # fc1 = nn.Linear(embDim, 9919)

    key = jax.random.PRNGKey(0)
    k_params, k_ids = jax.random.split(key)
    params = init_params(k_params, vocab=VOCAB, max_pos=MAX_POS,
                         D=D, H=H, L=L, F=F, n_out=N_OUT)

    # Module input dict: 'input_ids' / 'attention_mask' of shape (B, 1, S),
    # squeezed along dim=1 inside forward.
    input_ids = jax.random.randint(k_ids, (B, 1, S), 0, VOCAB, dtype=jnp.int32)
    attention_mask = jnp.ones((B, 1, S), dtype=jnp.int32)

    out = bert_only_forward(
        params,
        jnp.squeeze(input_ids, axis=1),
        jnp.squeeze(attention_mask, axis=1),
        num_heads=H,
    )
    out = jax.block_until_ready(out)
    assert out.shape == (B, N_OUT) and out.dtype == jnp.float32
    print("KERNEL_OK")
</pallas_src>

<mosaic_0001>
module attributes {stable_mosaic.version = 11 : i64} {
  func.func @_layernorm_kernel(%arg0: i32, %arg1: memref<32x128xbf16, #tpu.memory_space<vmem>>, %arg2: memref<1x128xf32, #tpu.memory_space<vmem>>, %arg3: memref<1x128xf32, #tpu.memory_space<vmem>>, %arg4: memref<32x128xbf16, #tpu.memory_space<vmem>>) attributes {dimension_semantics = [#tpu.dimension_semantics<parallel>], iteration_bounds = array<i64: 1>, scalar_prefetch = 0 : i64, scratch_operands = 0 : i64, tpu.core_type = #tpu.core_type<tc>, window_params = [{transform_indices = @transform_0, window_bounds = array<i64: 32, 128>}, {pipeline_mode = #tpu.pipeline_mode<synchronous>, transform_indices = @transform_1, window_bounds = array<i64: 1, 128>}, {pipeline_mode = #tpu.pipeline_mode<synchronous>, transform_indices = @transform_2, window_bounds = array<i64: 1, 128>}, {transform_indices = @transform_3, window_bounds = array<i64: 32, 128>}]} {
    %c0 = arith.constant 0 : index
    %c0_0 = arith.constant 0 : index
    %0 = vector.load %arg1[%c0, %c0_0] : memref<32x128xbf16, #tpu.memory_space<vmem>>, vector<32x128xbf16>
    %1 = arith.extf %0 : vector<32x128xbf16> to vector<32x128xf32>
    %cst = arith.constant dense<0.000000e+00> : vector<32xf32>
    %2 = vector.multi_reduction <add>, %1, %cst [1] : vector<32x128xf32> to vector<32xf32>
    %3 = vector.shape_cast %2 : vector<32xf32> to vector<32x1xf32>
    %cst_1 = arith.constant 1.280000e+02 : f32
    %4 = vector.broadcast %cst_1 : f32 to vector<32x1xf32>
    %5 = arith.divf %3, %4 : vector<32x1xf32>
    %6 = vector.broadcast %5 : vector<32x1xf32> to vector<32x128xf32>
    %7 = arith.subf %1, %6 : vector<32x128xf32>
    %8 = arith.mulf %7, %7 : vector<32x128xf32>
    %cst_2 = arith.constant dense<0.000000e+00> : vector<32xf32>
    %9 = vector.multi_reduction <add>, %8, %cst_2 [1] : vector<32x128xf32> to vector<32xf32>
    %10 = vector.shape_cast %9 : vector<32xf32> to vector<32x1xf32>
    %cst_3 = arith.constant 1.280000e+02 : f32
    %11 = vector.broadcast %cst_3 : f32 to vector<32x1xf32>
    %12 = arith.divf %10, %11 : vector<32x1xf32>
    %13 = vector.broadcast %5 : vector<32x1xf32> to vector<32x128xf32>
    %14 = arith.subf %1, %13 : vector<32x128xf32>
    %cst_4 = arith.constant 9.99999996E-13 : f32
    %15 = vector.broadcast %cst_4 : f32 to vector<32x1xf32>
    %16 = arith.addf %12, %15 : vector<32x1xf32>
    %17 = math.rsqrt %16 : vector<32x1xf32>
    %18 = vector.broadcast %17 : vector<32x1xf32> to vector<32x128xf32>
    %19 = arith.mulf %14, %18 : vector<32x128xf32>
    %c0_5 = arith.constant 0 : index
    %c0_6 = arith.constant 0 : index
    %20 = vector.load %arg2[%c0_5, %c0_6] : memref<1x128xf32, #tpu.memory_space<vmem>>, vector<1x128xf32>
    %21 = vector.broadcast %20 : vector<1x128xf32> to vector<32x128xf32>
    %22 = arith.mulf %19, %21 : vector<32x128xf32>
    %c0_7 = arith.constant 0 : index
    %c0_8 = arith.constant 0 : index
    %23 = vector.load %arg3[%c0_7, %c0_8] : memref<1x128xf32, #tpu.memory_space<vmem>>, vector<1x128xf32>
    %24 = vector.broadcast %23 : vector<1x128xf32> to vector<32x128xf32>
    %25 = arith.addf %22, %24 : vector<32x128xf32>
    %26 = arith.truncf %25 : vector<32x128xf32> to vector<32x128xbf16>
    %c0_9 = arith.constant 0 : index
    %c0_10 = arith.constant 0 : index
    %27 = vector.load %arg4[%c0_9, %c0_10] : memref<32x128xbf16, #tpu.memory_space<vmem>>, vector<32x128xbf16>
    tpu.vector_store %arg4[%c0_9, %c0_10], %26 {strides = array<i32>} : memref<32x128xbf16, #tpu.memory_space<vmem>>, vector<32x128xbf16>,
    return
  }
  func.func @transform_0(%arg0: i32) -> (i32, i32) {
    %c0_i32 = arith.constant 0 : i32
    %c0_i32_0 = arith.constant 0 : i32
    return %arg0, %c0_i32 : i32, i32
  }
  func.func @transform_1(%arg0: i32) -> (i32, i32) {
    %c0_i32 = arith.constant 0 : i32
    %c0_i32_0 = arith.constant 0 : i32
    %c0_i32_1 = arith.constant 0 : i32
    return %c0_i32, %c0_i32_0 : i32, i32
  }
  func.func @transform_2(%arg0: i32) -> (i32, i32) {
    %c0_i32 = arith.constant 0 : i32
    %c0_i32_0 = arith.constant 0 : i32
    %c0_i32_1 = arith.constant 0 : i32
    return %c0_i32, %c0_i32_0 : i32, i32
  }
  func.func @transform_3(%arg0: i32) -> (i32, i32) {
    %c0_i32 = arith.constant 0 : i32
    %c0_i32_0 = arith.constant 0 : i32
    return %arg0, %c0_i32 : i32, i32
  }
}

</mosaic_0001>

<bundles_post_ra>
// kernel: tpu_custom_call.1
= control target key start
LH: loop header
LB: loop body
LE: loop exit
PB: predicated region body
PF: predicated region fallthrough
CT: control target
= control target key end

     0   :  { %8 = vsyncpa [#allocation3], 0  ;;  %s291_s0 = inlined_call_operand.hbm [shape: bf16[32,128], index: 0, kind: input, shape index: {}]   ;;  %s292_s1 = inlined_call_operand.vmem [shape: f32[1,128], index: 1, kind: input, shape index: {}]   ;;  %s293_s2 = inlined_call_operand.vmem [shape: f32[1,128], index: 2, kind: input, shape index: {}]   ;;  %s294_s3 = inlined_call_operand.hbm [shape: bf16[32,128], index: 3, kind: output, shape index: {}]  }
   0x1   :  { %9 = vsyncpa [#allocation4], 0  ;;  %s231_s12 = smov [#allocation2]   ;;  %s183_s16 = scalar_lea.hbm %s291_s0, 256 }
   0x2   :  { %s15_s13 = sshll.u32 %s231_s12, 4  ;;  %p184_p0 = scmp.ne.s32.totalorder %s291_s0, %s183_s16  ;;  %s16_s13 = int_to_ptr.vmem [resolvable:$true] %s15_s13 }
   0x3   :  { %p187_p1 = scmp.lt.u32.totalorder %s183_s16, %s291_s0 }
   0x5   :  { %p189_p2 = pnand %p187_p1, %p184_p0 }
   0x7   :  { %192 = shalt.err (!%p189_p2)
}
   0x8   :  { %s193_s21 = scalar_lea.vmem %s16_s13, 256  ;;  %p198_p4 = scmp.lt.s32.totalorder %s16_s13, %s16_s13 }
   0x9   :  { %p194_p3 = scmp.ne.s32.totalorder %s16_s13, %s193_s21  ;;  %p199_p5 = scmp.lt.s32.totalorder %s193_s21, %s193_s21 }
   0xb   :  { %p200_p6 = por %p199_p5, %p198_p4 }
   0xd   :  { %p201_p7 = pnand %p200_p6, %p194_p3 }
   0xf   :  { %204 = shalt.err (!%p201_p7)
}
  0x10   :  { %s232_s22 = smov 64   ;;  %s233_s23 = smov 4  }
  0x11   :  { %21 = dma.hbm_to_vmem [thread:$0]  %s291_s0, 256, %s16_s13, [#allocation3], %s232_s22, %s232_s22, %s233_s23  }
  0x12   :  { %227 = dma.done.wait [#allocation3], 256  }
  0x13   :  { %228 = vsyncadd [#allocation3], 4294967040  ;;  %v152_v0 = vld [vmem:[#allocation2] sm:$0xff]   ;;  %v169_v1 = vld [vmem:[#allocation2 + $0x8] sm:$0xff]   ;;  %s234_s29 = smov [#allocation5]  }
  0x14   :  { %v153_v2 = vunpack.c.l.bf16 %v152_v0  ;;  %v157_v3 = vunpack.c.l.bf16 %v169_v1  ;;  %v154_v4 = vunpack.c.h.bf16 %v152_v0  ;;  %v158_v5 = vunpack.c.h.bf16 %v169_v1  ;;  %v141_v36 = vld [vmem:[%s292_s1] ss:$0 sm:$0xff]  ;;  %s129_s30 = sshll.u32 %s234_s29, 4  ;;  %s130_s30 = int_to_ptr.vmem [resolvable:$true] %s129_s30 }
  0x15   :  { %v142_v42 = vld [vmem:[%s293_s2] ss:$0 sm:$0xff]  ;;  %s205_s1 = scalar_lea.vmem %s130_s30, 256  ;;  %p210_p9 = scmp.lt.s32.totalorder %s130_s30, %s130_s30 }
  0x16   :  { %37 = vadd.xlane.f32.xlu0 %v153_v2  ;;  %41 = vadd.xlane.f32.xlu1 %v157_v3  ;;  %p206_p8 = scmp.ne.s32.totalorder %s130_s30, %s205_s1  ;;  %p211_p10 = scmp.lt.s32.totalorder %s205_s1, %s205_s1 }
  0x18   :  { %p212_p11 = por %p211_p10, %p210_p9 }
  0x1a   :  { %39 = vadd.xlane.f32.xlu0 %v154_v4  ;;  %43 = vadd.xlane.f32.xlu1 %v158_v5  ;;  %p213_p12 = pnand %p212_p11, %p206_p8 }
  0xa3   :  { %v38_v6 = vpop.xlane.xlu0 %37  ;;  %v42_v7 = vpop.xlane.xlu1 %41 }
  0xa4   :  { %v46_v8 = vmul.f32 0.0078125, %v38_v6  ;;  %v48_v9 = vmul.f32 0.0078125, %v42_v7 }
  0xa6   :  { %v50_v10 = vsub.f32 %v153_v2, %v46_v8  ;;  %v52_v11 = vsub.f32 %v157_v3, %v48_v9 }
  0xa7   :  { %v40_v12 = vpop.xlane.xlu0 %39  ;;  %v44_v13 = vpop.xlane.xlu1 %43 }
  0xa8   :  { %v47_v14 = vmul.f32 0.0078125, %v40_v12  ;;  %v54_v15 = vmul.f32 %v50_v10, %v50_v10  ;;  %v49_v16 = vmul.f32 0.0078125, %v44_v13  ;;  %v56_v19 = vmul.f32 %v52_v11, %v52_v11 }
  0xaa   :  { %v51_v17 = vsub.f32 %v154_v4, %v47_v14  ;;  %58 = vadd.xlane.f32.xlu0 %v54_v15  ;;  %v53_v18 = vsub.f32 %v158_v5, %v49_v16 }
  0xac   :  { %v55_v20 = vmul.f32 %v51_v17, %v51_v17  ;;  %v57_v21 = vmul.f32 %v53_v18, %v53_v18 }
  0xae   :  { %62 = vadd.xlane.f32.xlu0 %v56_v19  ;;  %60 = vadd.xlane.f32.xlu1 %v55_v20 }
  0xb2   :  { %64 = vadd.xlane.f32.xlu1 %v57_v21 }
 0x137   :  { %v59_v22 = vpop.xlane.xlu0 %58 }
 0x138   :  { %v66_v23 = vmul.f32 0.0078125, %v59_v22 }
 0x13a   :  { %v70_v24 = vadd.f32 1e-12, %v66_v23 }
 0x13b   :  { %v61_v25 = vpop.xlane.xlu1 %60  ;;  %v63_v26 = vpop.xlane.xlu0 %62 }
 0x13c   :  { %175 = vrsqrt.f32 %v70_v24  ;;  %v67_v27 = vmul.f32 0.0078125, %v61_v25  ;;  %v68_v28 = vmul.f32 0.0078125, %v63_v26 }
 0x13e   :  { %v71_v29 = vadd.f32 1e-12, %v67_v27  ;;  %v72_v30 = vadd.f32 1e-12, %v68_v28 }
 0x13f   :  { %v65_v31 = vpop.xlane.xlu1 %64 }
 0x140   :  { %177 = vrsqrt.f32 %v71_v29  ;;  %v69_v32 = vmul.f32 0.0078125, %v65_v31 }
 0x141   :  { %179 = vrsqrt.f32 %v72_v30 }
 0x142   :  { %v73_v33 = vadd.f32 1e-12, %v69_v32 }
 0x144   :  { %181 = vrsqrt.f32 %v73_v33 }
 0x146   :  { %v176_v34 = vpop.eup %175 }
 0x147   :  { %v78_v35 = vmul.f32 %v176_v34, %v50_v10 }
 0x149   :  { %v89_v40 = vmul.f32 %v141_v36, %v78_v35 }
 0x14a   :  { %v178_v37 = vpop.eup %177 }
 0x14b   :  { %v180_v38 = vpop.eup %179  ;;  %v79_v39 = vmul.f32 %v178_v37, %v51_v17  ;;  %v100_v47 = vadd.f32 %v142_v42, %v89_v40 }
 0x14c   :  { %v80_v41 = vmul.f32 %v180_v38, %v52_v11 }
 0x14d   :  { %v90_v43 = vmul.f32 %v141_v36, %v79_v39 }
 0x14e   :  { %v182_v44 = vpop.eup %181  ;;  %v91_v46 = vmul.f32 %v141_v36, %v80_v41 }
 0x14f   :  { %v81_v45 = vmul.f32 %v182_v44, %v53_v18  ;;  %v101_v48 = vadd.f32 %v142_v42, %v90_v43 }
 0x150   :  { %v102_v51 = vadd.f32 %v142_v42, %v91_v46 }
 0x151   :  { %v92_v49 = vmul.f32 %v141_v36, %v81_v45  ;;  %v162_v50 = vpack.c.bf16 %v101_v48, %v100_v47 }
 0x153   :  { %v103_v52 = vadd.f32 %v142_v42, %v92_v49  ;;  %163 = vst [vmem:[#allocation5] sm:$0xff] %v162_v50  }
 0x155   :  { %v167_v53 = vpack.c.bf16 %v103_v52, %v102_v51 }
 0x157   :  { %170 = vst [vmem:[#allocation5 + $0x8] sm:$0xff] %v167_v53  }
 0x158   :  { %216 = shalt.err (!%p213_p12)
}
 0x159   :  { %s217_s5 = scalar_lea.hbm %s294_s3, 256 }
 0x15a   :  { %p218_p13 = scmp.ne.s32.totalorder %s294_s3, %s217_s5  ;;  %p221_p0 = scmp.lt.u32.totalorder %s217_s5, %s294_s3 }
 0x15c   :  { %p223_p1 = pnand %p221_p0, %p218_p13 }
 0x15e   :  { %226 = shalt.err (!%p223_p1)
}
 0x15f   :  { %135 = dma.vmem_to_hbm [thread:$0]  %s130_s30, 256, %s294_s3, [#allocation4], %s232_s22, %s232_s22, %s233_s23  }
 0x160   :  { %229 = dma.done.wait [#allocation4], 256  }
 0x161   :  { %230 = vsyncadd [#allocation4], 4294967040 }
 0x162   :  { %139 = vsyncpa [#allocation3], 1 }
 0x163   :  { %140 = vsyncpa [#allocation4], 1 }

</bundles_post_ra>
